<compile_context>
chip_gen: v5e
topology: v5e:2x2
jax: 0.10.0
libtpu: 0.0.40
codegen_flags: <defaults>
</compile_context>

<pallas_src>
import jax
import jax.numpy as jnp
from jax import lax
from jax.experimental import pallas as pl
from jax.experimental.pallas import tpu as pltpu


def _round_up(x, m):
    return (x + m - 1) // m * m


def rnn_kernel(x_ref, wih_ref, whh_ref, b_ref, wout_ref, bout_ref,
               out_ref, h_ref):
    """Elman-RNN: batched input projection -> serial recurrence -> batched head."""
    seq_pad, hid_pad = h_ref.shape
    n_groups = seq_pad // 8  # seq_pad is always a multiple of 8

    # ---- Hoisted input projection, written in place: h_ref <- X @ W_ih + b ------
    h_ref[...] = (
        jnp.dot(x_ref[...], wih_ref[...], preferred_element_type=jnp.float32)
        + b_ref[...]
    )

    # W_hh is the only weight needed inside the loop; keep it resident in vregs.
    # TODO(synk): pltpu.matmul_push_rhs weight pinning could drop the per-step MXU
    # weight push, but jnp.dot is kept here for robust lowering across TPU gens.
    whh = whh_ref[...]

    def group_body(g, h):
        t0 = pl.multiple_of(g * 8, 8)
        pre_g = h_ref[pl.ds(t0, 8), :]            # (8, hid_pad) single full-tile load
        rows = []
        for r in range(8):                        # serial chain, statically unrolled
            h = jnp.tanh(
                pre_g[r:r + 1, :]
                + jnp.dot(h, whh, preferred_element_type=jnp.float32))
            rows.append(h)
        # One unmasked (8, hid_pad) store per group (overwrites the pre rows).
        h_ref[pl.ds(t0, 8), :] = jnp.concatenate(rows, axis=0)
        return h

    h0 = jnp.zeros((1, hid_pad), jnp.float32)
    # Each group body is already 8-way unrolled; fully unroll the outer loop only
    # for short sequences so vreg pressure stays bounded for long ones.
    lax.fori_loop(0, n_groups, group_body, h0, unroll=(n_groups <= 8))

    # ---- Hoisted output projection + single dense store -------------------------
    out_ref[...] = (
        jnp.dot(h_ref[...], wout_ref[...], preferred_element_type=jnp.float32)
        + bout_ref[...]
    ).astype(out_ref.dtype)


def prepare_params(params):
    """One-time prep: pad + transpose weights to lane-major (in, out) slabs."""
    w_ih, w_hh, b_ih, b_hh, w_lin, b_lin = (
        params["w_ih"], params["w_hh"], params["b_ih"], params["b_hh"],
        params["w_lin"], params["b_lin"])
    hidden_size, input_size = w_ih.shape
    output_size = w_lin.shape[0]

    in_pad = _round_up(input_size, 128)
    hid_pad = _round_up(hidden_size, 128)
    out_pad = _round_up(output_size, 128)

    f32 = jnp.float32
    return {
        "wih": jnp.zeros((in_pad, hid_pad), f32).at[:input_size, :hidden_size].set(w_ih.T),
        "whh": jnp.zeros((hid_pad, hid_pad), f32).at[:hidden_size, :hidden_size].set(w_hh.T),
        "b": jnp.zeros((1, hid_pad), f32).at[0, :hidden_size].set(b_ih + b_hh),
        "wout": jnp.zeros((hid_pad, out_pad), f32).at[:hidden_size, :output_size].set(w_lin.T),
        "bout": jnp.zeros((1, out_pad), f32).at[0, :output_size].set(b_lin),
        "input_size": input_size,
        "output_size": output_size,
        "in_pad": in_pad,
        "hid_pad": hid_pad,
        "out_pad": out_pad,
    }


def rnn_model_forward(x, prepped):
    """x: (seq, input_size) float32.  Returns (1, seq, output_size) like PyTorch."""
    seq, input_size = x.shape
    assert input_size == prepped["input_size"]
    seq_pad = _round_up(seq, 8)
    in_pad, hid_pad, out_pad = prepped["in_pad"], prepped["hid_pad"], prepped["out_pad"]

    # Only x is padded per call; all weight slabs were prepared once.
    x_p = jnp.zeros((seq_pad, in_pad), jnp.float32).at[:seq, :input_size].set(x)

    # TODO(synk): for very long sequences on v7x (64 MiB VMEM) the single-block
    # layout should chunk the two projections over seq with a grid; fine at these sizes.
    out_p = pl.pallas_call(
        rnn_kernel,
        out_shape=jax.ShapeDtypeStruct((seq_pad, out_pad), jnp.float32),
        in_specs=[
            pl.BlockSpec(memory_space=pltpu.VMEM),   # x
            pl.BlockSpec(memory_space=pltpu.VMEM),   # W_ih (in_pad, hid_pad)
            pl.BlockSpec(memory_space=pltpu.VMEM),   # W_hh (hid_pad, hid_pad)
            pl.BlockSpec(memory_space=pltpu.VMEM),   # b = b_ih + b_hh
            pl.BlockSpec(memory_space=pltpu.VMEM),   # W_out (hid_pad, out_pad)
            pl.BlockSpec(memory_space=pltpu.VMEM),   # b_out
        ],
        out_specs=pl.BlockSpec(memory_space=pltpu.VMEM),
        scratch_shapes=[
            pltpu.VMEM((seq_pad, hid_pad), jnp.float32),   # holds pre, then H
        ],
    )(x_p, prepped["wih"], prepped["whh"], prepped["b"],
      prepped["wout"], prepped["bout"])

    out = out_p[:seq, :prepped["output_size"]]
    return out[None, :, :]  # (1, seq, output_size) — matches PyTorch's unsqueeze(0)


def rnn_model_reference(x, params):
    """Pure-JAX reference mirroring torch nn.RNN(tanh) + nn.Linear."""
    w_ih, w_hh, b_ih, b_hh, w_lin, b_lin = (
        params["w_ih"], params["w_hh"], params["b_ih"], params["b_hh"],
        params["w_lin"], params["b_lin"])
    hidden_size = w_hh.shape[0]

    def step(h, x_t):
        h_new = jnp.tanh(x_t @ w_ih.T + b_ih + h @ w_hh.T + b_hh)
        return h_new, h_new

    h0 = jnp.zeros((hidden_size,), jnp.float32)
    _, hs = lax.scan(step, h0, x)
    out = hs @ w_lin.T + b_lin
    return out[None, :, :]


def init_params(key, input_size, hidden_size, output_size):
    """Deterministic init following PyTorch's uniform(-1/sqrt(H), 1/sqrt(H))."""
    ks = jax.random.split(key, 6)
    bound = 1.0 / jnp.sqrt(hidden_size)
    u = lambda k, shape, b: jax.random.uniform(k, shape, jnp.float32, -b, b)
    return {
        "w_ih": u(ks[0], (hidden_size, input_size), bound),
        "w_hh": u(ks[1], (hidden_size, hidden_size), bound),
        "b_ih": u(ks[2], (hidden_size,), bound),
        "b_hh": u(ks[3], (hidden_size,), bound),
        "w_lin": u(ks[4], (output_size, hidden_size), bound),
        "b_lin": u(ks[5], (output_size,), bound),
    }


if __name__ == "__main__":
    input_size, hidden_size, output_size = 4, 32, 1
    seq = 8

    key = jax.random.PRNGKey(0)
    k_x, k_p = jax.random.split(key)
    x = jax.random.normal(k_x, (seq, input_size), jnp.float32)
    params = init_params(k_p, input_size, hidden_size, output_size)

    prepped = prepare_params(params)          # one-time padded/transposed weights
    out = rnn_model_forward(x, prepped)
    out = jax.block_until_ready(out)

    ref = jax.block_until_ready(rnn_model_reference(x, params))
    assert out.shape == (1, seq, output_size)
    assert jnp.allclose(out, ref, atol=1e-5, rtol=1e-5), "mismatch vs reference"

    print("KERNEL_OK")
</pallas_src>

<mosaic_0001>
module attributes {stable_mosaic.version = 11 : i64} {
  func.func @rnn_kernel(%arg0: memref<8x128xf32, #tpu.memory_space<vmem>>, %arg1: memref<128x128xf32, #tpu.memory_space<vmem>>, %arg2: memref<128x128xf32, #tpu.memory_space<vmem>>, %arg3: memref<1x128xf32, #tpu.memory_space<vmem>>, %arg4: memref<128x128xf32, #tpu.memory_space<vmem>>, %arg5: memref<1x128xf32, #tpu.memory_space<vmem>>, %arg6: memref<8x128xf32, #tpu.memory_space<vmem>>, %arg7: memref<8x128xf32, #tpu.memory_space<vmem>>) attributes {dimension_semantics = [], scalar_prefetch = 0 : i64, scratch_operands = 1 : i64, tpu.core_type = #tpu.core_type<tc>} {
    %c0 = arith.constant 0 : index
    %c0_0 = arith.constant 0 : index
    %0 = vector.load %arg0[%c0, %c0_0] : memref<8x128xf32, #tpu.memory_space<vmem>>, vector<8x128xf32>
    %c0_1 = arith.constant 0 : index
    %c0_2 = arith.constant 0 : index
    %1 = vector.load %arg1[%c0_1, %c0_2] : memref<128x128xf32, #tpu.memory_space<vmem>>, vector<128x128xf32>
    %cst = arith.constant dense<0.000000e+00> : vector<8x128xf32>
    %2 = tpu.matmul %0, %1, %cst {dimension_numbers = #tpu.dot_dimension_numbers<[1], [0], [0], [1], [0, 0, 1, 1], [], []>} : vector<8x128xf32>, vector<128x128xf32>, vector<8x128xf32> -> vector<8x128xf32>
    %c0_3 = arith.constant 0 : index
    %c0_4 = arith.constant 0 : index
    %3 = vector.load %arg3[%c0_3, %c0_4] : memref<1x128xf32, #tpu.memory_space<vmem>>, vector<1x128xf32>
    %4 = vector.broadcast %3 : vector<1x128xf32> to vector<8x128xf32>
    %5 = arith.addf %2, %4 : vector<8x128xf32>
    %c0_5 = arith.constant 0 : index
    %c0_6 = arith.constant 0 : index
    %6 = vector.load %arg7[%c0_5, %c0_6] : memref<8x128xf32, #tpu.memory_space<vmem>>, vector<8x128xf32>
    tpu.vector_store %arg7[%c0_5, %c0_6], %5 {strides = array<i32>} : memref<8x128xf32, #tpu.memory_space<vmem>>, vector<8x128xf32>,
    %c0_7 = arith.constant 0 : index
    %c0_8 = arith.constant 0 : index
    %7 = vector.load %arg2[%c0_7, %c0_8] : memref<128x128xf32, #tpu.memory_space<vmem>>, vector<128x128xf32>
    %cst_9 = arith.constant 0.000000e+00 : f32
    %8 = vector.broadcast %cst_9 : f32 to vector<1x128xf32>
    %c0_i32 = arith.constant 0 : i32
    %c8_i32 = arith.constant 8 : i32
    %9 = arith.muli %c0_i32, %c8_i32 : i32
    %10 = tpu.assume_multiple %9, 8 : i32
    %11 = arith.index_cast %10 : i32 to index
    %c0_10 = arith.constant 0 : index
    %12 = vector.load %arg7[%11, %c0_10] : memref<8x128xf32, #tpu.memory_space<vmem>>, vector<8x128xf32>
    %13 = vector.extract_strided_slice %12 {offsets = [0, 0], sizes = [1, 128], strides = [1, 1]} : vector<8x128xf32> to vector<1x128xf32>
    %cst_11 = arith.constant dense<0.000000e+00> : vector<1x128xf32>
    %14 = tpu.matmul %8, %7, %cst_11 {dimension_numbers = #tpu.dot_dimension_numbers<[1], [0], [0], [1], [0, 0, 1, 1], [], []>} : vector<1x128xf32>, vector<128x128xf32>, vector<1x128xf32> -> vector<1x128xf32>
    %15 = arith.addf %13, %14 : vector<1x128xf32>
    %16 = math.tanh %15 : vector<1x128xf32>
    %17 = vector.extract_strided_slice %12 {offsets = [1, 0], sizes = [1, 128], strides = [1, 1]} : vector<8x128xf32> to vector<1x128xf32>
    %cst_12 = arith.constant dense<0.000000e+00> : vector<1x128xf32>
    %18 = tpu.matmul %16, %7, %cst_12 {dimension_numbers = #tpu.dot_dimension_numbers<[1], [0], [0], [1], [0, 0, 1, 1], [], []>} : vector<1x128xf32>, vector<128x128xf32>, vector<1x128xf32> -> vector<1x128xf32>
    %19 = arith.addf %17, %18 : vector<1x128xf32>
    %20 = math.tanh %19 : vector<1x128xf32>
    %21 = vector.extract_strided_slice %12 {offsets = [2, 0], sizes = [1, 128], strides = [1, 1]} : vector<8x128xf32> to vector<1x128xf32>
    %cst_13 = arith.constant dense<0.000000e+00> : vector<1x128xf32>
    %22 = tpu.matmul %20, %7, %cst_13 {dimension_numbers = #tpu.dot_dimension_numbers<[1], [0], [0], [1], [0, 0, 1, 1], [], []>} : vector<1x128xf32>, vector<128x128xf32>, vector<1x128xf32> -> vector<1x128xf32>
    %23 = arith.addf %21, %22 : vector<1x128xf32>
    %24 = math.tanh %23 : vector<1x128xf32>
    %25 = vector.extract_strided_slice %12 {offsets = [3, 0], sizes = [1, 128], strides = [1, 1]} : vector<8x128xf32> to vector<1x128xf32>
    %cst_14 = arith.constant dense<0.000000e+00> : vector<1x128xf32>
    %26 = tpu.matmul %24, %7, %cst_14 {dimension_numbers = #tpu.dot_dimension_numbers<[1], [0], [0], [1], [0, 0, 1, 1], [], []>} : vector<1x128xf32>, vector<128x128xf32>, vector<1x128xf32> -> vector<1x128xf32>
    %27 = arith.addf %25, %26 : vector<1x128xf32>
    %28 = math.tanh %27 : vector<1x128xf32>
    %29 = vector.extract_strided_slice %12 {offsets = [4, 0], sizes = [1, 128], strides = [1, 1]} : vector<8x128xf32> to vector<1x128xf32>
    %cst_15 = arith.constant dense<0.000000e+00> : vector<1x128xf32>
    %30 = tpu.matmul %28, %7, %cst_15 {dimension_numbers = #tpu.dot_dimension_numbers<[1], [0], [0], [1], [0, 0, 1, 1], [], []>} : vector<1x128xf32>, vector<128x128xf32>, vector<1x128xf32> -> vector<1x128xf32>
    %31 = arith.addf %29, %30 : vector<1x128xf32>
    %32 = math.tanh %31 : vector<1x128xf32>
    %33 = vector.extract_strided_slice %12 {offsets = [5, 0], sizes = [1, 128], strides = [1, 1]} : vector<8x128xf32> to vector<1x128xf32>
    %cst_16 = arith.constant dense<0.000000e+00> : vector<1x128xf32>
    %34 = tpu.matmul %32, %7, %cst_16 {dimension_numbers = #tpu.dot_dimension_numbers<[1], [0], [0], [1], [0, 0, 1, 1], [], []>} : vector<1x128xf32>, vector<128x128xf32>, vector<1x128xf32> -> vector<1x128xf32>
    %35 = arith.addf %33, %34 : vector<1x128xf32>
    %36 = math.tanh %35 : vector<1x128xf32>
    %37 = vector.extract_strided_slice %12 {offsets = [6, 0], sizes = [1, 128], strides = [1, 1]} : vector<8x128xf32> to vector<1x128xf32>
    %cst_17 = arith.constant dense<0.000000e+00> : vector<1x128xf32>
    %38 = tpu.matmul %36, %7, %cst_17 {dimension_numbers = #tpu.dot_dimension_numbers<[1], [0], [0], [1], [0, 0, 1, 1], [], []>} : vector<1x128xf32>, vector<128x128xf32>, vector<1x128xf32> -> vector<1x128xf32>
    %39 = arith.addf %37, %38 : vector<1x128xf32>
    %40 = math.tanh %39 : vector<1x128xf32>
    %41 = vector.extract_strided_slice %12 {offsets = [7, 0], sizes = [1, 128], strides = [1, 1]} : vector<8x128xf32> to vector<1x128xf32>
    %cst_18 = arith.constant dense<0.000000e+00> : vector<1x128xf32>
    %42 = tpu.matmul %40, %7, %cst_18 {dimension_numbers = #tpu.dot_dimension_numbers<[1], [0], [0], [1], [0, 0, 1, 1], [], []>} : vector<1x128xf32>, vector<128x128xf32>, vector<1x128xf32> -> vector<1x128xf32>
    %43 = arith.addf %41, %42 : vector<1x128xf32>
    %44 = math.tanh %43 : vector<1x128xf32>
    %45 = tpu.concatenate %16, %20, %24, %28, %32, %36, %40, %44 in 0 : vector<1x128xf32>, vector<1x128xf32>, vector<1x128xf32>, vector<1x128xf32>, vector<1x128xf32>, vector<1x128xf32>, vector<1x128xf32>, vector<1x128xf32> -> vector<8x128xf32>
    %46 = arith.index_cast %10 : i32 to index
    %c0_19 = arith.constant 0 : index
    %47 = vector.load %arg7[%46, %c0_19] : memref<8x128xf32, #tpu.memory_space<vmem>>, vector<8x128xf32>
    tpu.vector_store %arg7[%46, %c0_19], %45 {strides = array<i32>} : memref<8x128xf32, #tpu.memory_space<vmem>>, vector<8x128xf32>,
    %c1_i32 = arith.constant 1 : i32
    %c0_20 = arith.constant 0 : index
    %c0_21 = arith.constant 0 : index
    %48 = vector.load %arg7[%c0_20, %c0_21] : memref<8x128xf32, #tpu.memory_space<vmem>>, vector<8x128xf32>
    %c0_22 = arith.constant 0 : index
    %c0_23 = arith.constant 0 : index
    %49 = vector.load %arg4[%c0_22, %c0_23] : memref<128x128xf32, #tpu.memory_space<vmem>>, vector<128x128xf32>
    %cst_24 = arith.constant dense<0.000000e+00> : vector<8x128xf32>
    %50 = tpu.matmul %48, %49, %cst_24 {dimension_numbers = #tpu.dot_dimension_numbers<[1], [0], [0], [1], [0, 0, 1, 1], [], []>} : vector<8x128xf32>, vector<128x128xf32>, vector<8x128xf32> -> vector<8x128xf32>
    %c0_25 = arith.constant 0 : index
    %c0_26 = arith.constant 0 : index
    %51 = vector.load %arg5[%c0_25, %c0_26] : memref<1x128xf32, #tpu.memory_space<vmem>>, vector<1x128xf32>
    %52 = vector.broadcast %51 : vector<1x128xf32> to vector<8x128xf32>
    %53 = arith.addf %50, %52 : vector<8x128xf32>
    %c0_27 = arith.constant 0 : index
    %c0_28 = arith.constant 0 : index
    %54 = vector.load %arg6[%c0_27, %c0_28] : memref<8x128xf32, #tpu.memory_space<vmem>>, vector<8x128xf32>
    tpu.vector_store %arg6[%c0_27, %c0_28], %53 {strides = array<i32>} : memref<8x128xf32, #tpu.memory_space<vmem>>, vector<8x128xf32>,
    return
  }
}

</mosaic_0001>

<bundles_post_ra>
// kernel: tpu_custom_call.1
= control target key start
LH: loop header
LB: loop body
LE: loop exit
PB: predicated region body
PF: predicated region fallthrough
CT: control target
= control target key end

     0   :  { %11 = vsyncpa [#allocation4], 0  ;;  %s823_s0 = inlined_call_operand.hbm [shape: f32[8,128], index: 0, kind: input, shape index: {}]   ;;  %s824_s1 = inlined_call_operand.hbm [shape: f32[128,128], index: 1, kind: input, shape index: {}]   ;;  %s825_s2 = inlined_call_operand.hbm [shape: f32[128,128], index: 2, kind: input, shape index: {}]   ;;  %s826_s3 = inlined_call_operand.vmem [shape: f32[1,128], index: 3, kind: input, shape index: {}]   ;;  %s827_s4 = inlined_call_operand.hbm [shape: f32[128,128], index: 4, kind: input, shape index: {}]   ;;  %s828_s5 = inlined_call_operand.vmem [shape: f32[1,128], index: 5, kind: input, shape index: {}]   ;;  %s829_s6 = inlined_call_operand.hbm [shape: f32[8,128], index: 6, kind: output, shape index: {}]  }
   0x1   :  { %12 = vsyncpa [#allocation7], 0 }
   0x2   :  { %13 = vsyncpa [#allocation10], 0  ;;  %s30_s23 = sshll.u32 %s824_s1, 4  ;;  %s31_s23 = int_to_ptr.hbm [resolvable:$true] %s30_s23 }
   0x3   :  { %14 = vsyncpa [#allocation5], 0  ;;  %s589_s24 = smov [#allocation6]   ;;  %s20_s28 = sshll.u32 %s823_s0, 4  ;;  %s21_s28 = int_to_ptr.hbm [resolvable:$true] %s20_s28 }
   0x4   :  { %s32_s25 = sshll.u32 %s589_s24, 4  ;;  %s590_s29 = smov 128   ;;  %s33_s25 = int_to_ptr.vmem [resolvable:$true] %s32_s25 }
   0x5   :  { %s591_s30 = smov 8   ;;  %s592_s7 = smov [#allocation3]  }
   0x6   :  { %38 = dma.hbm_to_vmem [thread:$0]  %s31_s23, 2048, %s33_s25, [#allocation7], %s590_s29, %s590_s29, %s591_s30  }
   0x7   :  { %s22_s8 = sshll.u32 %s592_s7, 4  ;;  %s43_s11 = sshll.u32 %s825_s2, 4  ;;  %s23_s8 = int_to_ptr.vmem [resolvable:$true] %s22_s8  ;;  %s44_s11 = int_to_ptr.hbm [resolvable:$true] %s43_s11 }
   0x8   :  { %25 = dma.hbm_to_vmem [thread:$0]  %s21_s28, 128, %s23_s8, [#allocation4]  }
   0x9   :  { %s58_s13 = sshll.u32 %s827_s4, 4  ;;  %s593_s14 = smov [#allocation8]   ;;  %s59_s13 = int_to_ptr.hbm [resolvable:$true] %s58_s13 }
   0xa   :  { %s45_s15 = sshll.u32 %s593_s14, 4  ;;  %s594_s0 = smov [#allocation9]   ;;  %s46_s15 = int_to_ptr.vmem [resolvable:$true] %s45_s15 }
   0xb   :  { %51 = dma.hbm_to_vmem [thread:$0]  %s44_s11, 2048, %s46_s15, [#allocation7], %s590_s29, %s590_s29, %s591_s30  }
   0xc   :  { %s60_s16 = sshll.u32 %s594_s0, 4  ;;  %s61_s16 = int_to_ptr.vmem [resolvable:$true] %s60_s16 }
   0xd   :  { %66 = dma.hbm_to_vmem [thread:$0]  %s59_s13, 2048, %s61_s16, [#allocation10], %s590_s29, %s590_s29, %s591_s30  }
   0xe   :  { %581 = dma.done.wait [#allocation4], 128  }
   0xf   :  { %582 = vsyncadd [#allocation4], 4294967168 }
  0x10   :  { %583 = dma.done.wait [#allocation7], 4096  }
  0x11   :  { %584 = vsyncadd [#allocation7], 4294963200 }
  0x12   :  { %585 = dma.done.wait [#allocation10], 2048  }
  0x13   :  { %586 = vsyncadd [#allocation10], 4294965248  ;;  %v101_v0 = vld [vmem:[#allocation6 + $0x78] sm:$0xff]  ;;  %v100_v1 = vld [vmem:[#allocation6 + $0x70] sm:$0xff]  ;;  %v595_v33 = vmov 0.0   ;;  %vm359_vm0 = vcmask 1040384  }
  0x14   :  { %v644_v2 = vld [vmem:[#allocation8 + $0x78] sm:$0xff]  ;;  %106 = vmatpush.msra.mxu0 %v101_v0  ;;  %v647_v3 = vld [vmem:[#allocation8 + $0x70] sm:$0xff]  ;;  %v99_v4 = vld [vmem:[#allocation6 + $0x68] sm:$0xff]  ;;  %vm361_vm1 = vcmask 1041408   ;;  %vm363_vm2 = vcmask 1042432   ;;  %vm365_vm3 = vcmask 1043456  }
  0x15   :  { %144 = vmatpush.msra.mxu1 %v644_v2  ;;  %v649_v5 = vld [vmem:[#allocation8 + $0x68] sm:$0xff]  ;;  %166 = vmatpush.msra.mxu2 %v644_v2  ;;  %v98_v6 = vld [vmem:[#allocation6 + $0x60] sm:$0xff]  ;;  %v97_v8 = vld [vmem:[#allocation6 + $0x58] sm:$0xff]  ;;  %vm367_vm4 = vcmask 1044480   ;;  %vm369_vm5 = vcmask 1045504   ;;  %vm371_vm6 = vcmask 1046528  }
  0x16   :  { %194 = vmatpush.msra.mxu3 %v644_v2  ;;  %107 = vmatpush.msra.mxu0 %v100_v1  ;;  %v654_v7 = vld [vmem:[#allocation8 + $0x60] sm:$0xff]  ;;  %v659_v9 = vld [vmem:[#allocation8 + $0x58] sm:$0xff]  ;;  %v96_v10 = vld [vmem:[#allocation6 + $0x50] sm:$0xff]  ;;  %s596_s18 = smov [#allocation11]   ;;  %s423_s22 = sshll.u32 %s829_s6, 4  ;;  %s424_s22 = int_to_ptr.hbm [resolvable:$true] %s423_s22 }
  0x17   :  { %145 = vmatpush.msra.mxu1 %v647_v3  ;;  %167 = vmatpush.msra.mxu2 %v647_v3  ;;  %v664_v11 = vld [vmem:[#allocation8 + $0x50] sm:$0xff]  ;;  %v95_v12 = vld [vmem:[#allocation6 + $0x48] sm:$0xff]  ;;  %v94_v14 = vld [vmem:[#allocation6 + $0x40] sm:$0xff]  ;;  %s421_s19 = sshll.u32 %s596_s18, 4  ;;  %s422_s19 = int_to_ptr.vmem [resolvable:$true] %s421_s19 }
  0x18   :  { %195 = vmatpush.msra.mxu3 %v647_v3  ;;  %108 = vmatpush.msra.mxu0 %v99_v4  ;;  %v669_v13 = vld [vmem:[#allocation8 + $0x48] sm:$0xff]  ;;  %v674_v15 = vld [vmem:[#allocation8 + $0x40] sm:$0xff]  ;;  %v93_v16 = vld [vmem:[#allocation6 + $0x38] sm:$0xff] }
  0x19   :  { %146 = vmatpush.msra.mxu1 %v649_v5  ;;  %168 = vmatpush.msra.mxu2 %v649_v5  ;;  %v679_v17 = vld [vmem:[#allocation8 + $0x38] sm:$0xff]  ;;  %v92_v18 = vld [vmem:[#allocation6 + $0x30] sm:$0xff]  ;;  %v91_v20 = vld [vmem:[#allocation6 + $0x28] sm:$0xff] }
  0x1a   :  { %196 = vmatpush.msra.mxu3 %v649_v5  ;;  %109 = vmatpush.msra.mxu0 %v98_v6  ;;  %v684_v19 = vld [vmem:[#allocation8 + $0x30] sm:$0xff]  ;;  %v689_v21 = vld [vmem:[#allocation8 + $0x28] sm:$0xff]  ;;  %v90_v22 = vld [vmem:[#allocation6 + $0x20] sm:$0xff] }
  0x1b   :  { %147 = vmatpush.msra.mxu1 %v654_v7  ;;  %169 = vmatpush.msra.mxu2 %v654_v7  ;;  %v694_v23 = vld [vmem:[#allocation8 + $0x20] sm:$0xff]  ;;  %v89_v24 = vld [vmem:[#allocation6 + $0x18] sm:$0xff]  ;;  %v88_v26 = vld [vmem:[#allocation6 + $0x10] sm:$0xff] }
  0x1c   :  { %197 = vmatpush.msra.mxu3 %v654_v7  ;;  %110 = vmatpush.msra.mxu0 %v97_v8  ;;  %v699_v25 = vld [vmem:[#allocation8 + $0x18] sm:$0xff]  ;;  %v704_v27 = vld [vmem:[#allocation8 + $0x10] sm:$0xff]  ;;  %v87_v28 = vld [vmem:[#allocation6 + $0x8] sm:$0xff] }
  0x1d   :  { %148 = vmatpush.msra.mxu1 %v659_v9  ;;  %170 = vmatpush.msra.mxu2 %v659_v9  ;;  %v709_v29 = vld [vmem:[#allocation8 + $0x8] sm:$0xff]  ;;  %v86_v30 = vld [vmem:[#allocation6] sm:$0xff]  ;;  %v85_v32 = vld [vmem:[#allocation3] sm:$0xff] }
  0x1e   :  { %198 = vmatpush.msra.mxu3 %v659_v9  ;;  %111 = vmatpush.msra.mxu0 %v96_v10  ;;  %v714_v31 = vld [vmem:[#allocation8] sm:$0xff]  ;;  %v443_v34 = vld [vmem:[%s826_s3] ss:$0 sm:$0xff]  ;;  %v388_v8 = vld [vmem:[#allocation9 + $0x68] sm:$0xff] }
  0x1f   :  { %149 = vmatpush.msra.mxu1 %v664_v11  ;;  %171 = vmatpush.msra.mxu2 %v664_v11  ;;  %v390_v6 = vld [vmem:[#allocation9 + $0x78] sm:$0xff] }
  0x20   :  { %199 = vmatpush.msra.mxu3 %v664_v11  ;;  %112 = vmatpush.msra.mxu0 %v95_v12  ;;  %v386_v10 = vld [vmem:[#allocation9 + $0x58] sm:$0xff]  ;;  %v384_v12 = vld [vmem:[#allocation9 + $0x48] sm:$0xff] }
  0x21   :  { %150 = vmatpush.msra.mxu1 %v669_v13  ;;  %172 = vmatpush.msra.mxu2 %v669_v13 }
  0x22   :  { %200 = vmatpush.msra.mxu3 %v669_v13  ;;  %113 = vmatpush.msra.mxu0 %v94_v14  ;;  %v382_v14 = vld [vmem:[#allocation9 + $0x38] sm:$0xff] }
  0x23   :  { %151 = vmatpush.msra.mxu1 %v674_v15  ;;  %173 = vmatpush.msra.mxu2 %v674_v15 }
  0x24   :  { %201 = vmatpush.msra.mxu3 %v674_v15  ;;  %114 = vmatpush.msra.mxu0 %v93_v16 }
  0x25   :  { %152 = vmatpush.msra.mxu1 %v679_v17  ;;  %174 = vmatpush.msra.mxu2 %v679_v17 }
  0x26   :  { %202 = vmatpush.msra.mxu3 %v679_v17  ;;  %115 = vmatpush.msra.mxu0 %v92_v18 }
  0x27   :  { %153 = vmatpush.msra.mxu1 %v684_v19  ;;  %175 = vmatpush.msra.mxu2 %v684_v19 }
  0x28   :  { %203 = vmatpush.msra.mxu3 %v684_v19  ;;  %116 = vmatpush.msra.mxu0 %v91_v20 }
  0x29   :  { %154 = vmatpush.msra.mxu1 %v689_v21  ;;  %176 = vmatpush.msra.mxu2 %v689_v21 }
  0x2a   :  { %204 = vmatpush.msra.mxu3 %v689_v21  ;;  %117 = vmatpush.msra.mxu0 %v90_v22  ;;  %v380_v22 = vld [vmem:[#allocation9 + $0x28] sm:$0xff] }
  0x2b   :  { %155 = vmatpush.msra.mxu1 %v694_v23  ;;  %177 = vmatpush.msra.mxu2 %v694_v23 }
  0x2c   :  { %205 = vmatpush.msra.mxu3 %v694_v23  ;;  %118 = vmatpush.msra.mxu0 %v89_v24  ;;  %v378_v24 = vld [vmem:[#allocation9 + $0x18] sm:$0xff] }
  0x2d   :  { %156 = vmatpush.msra.mxu1 %v699_v25  ;;  %178 = vmatpush.msra.mxu2 %v699_v25 }
  0x2e   :  { %206 = vmatpush.msra.mxu3 %v699_v25  ;;  %119 = vmatpush.msra.mxu0 %v88_v26  ;;  %v376_v26 = vld [vmem:[#allocation9 + $0x8] sm:$0xff] }
  0x2f   :  { %157 = vmatpush.msra.mxu1 %v704_v27  ;;  %179 = vmatpush.msra.mxu2 %v704_v27 }
  0x30   :  { %207 = vmatpush.msra.mxu3 %v704_v27  ;;  %120 = vmatpush.msra.mxu0 %v87_v28 }
  0x31   :  { %158 = vmatpush.msra.mxu1 %v709_v29  ;;  %180 = vmatpush.msra.mxu2 %v709_v29 }
  0x32   :  { %208 = vmatpush.msra.mxu3 %v709_v29  ;;  %121 = vmatpush.msra.mxu0 %v86_v30 }
  0x33   :  { %159 = vmatpush.msra.mxu1 %v714_v31  ;;  %122 = vmatmul.f32.vlgmr.msra.gmra.mxu0 %v85_v32 }
  0x34   :  { %160 = vmatmul.f32.vlgmr.msra.gmra.mxu1 %v595_v33  ;;  %181 = vmatpush.msra.mxu2 %v714_v31  ;;  %v444_v33 = vld [vmem:[%s828_s5] ss:$0 sm:$0xff] }
  0x35   :  { %209 = vmatpush.msra.mxu3 %v714_v31  ;;  %222 = vmatpush.msrb.mxu0 %v644_v2 }
  0x36   :  { %250 = vmatpush.msrb.mxu1 %v644_v2  ;;  %278 = vmatpush.msrb.mxu2 %v644_v2 }
  0x37   :  { %306 = vmatpush.msrb.mxu3 %v644_v2  ;;  %223 = vmatpush.msrb.mxu0 %v647_v3 }
  0x38   :  { %251 = vmatpush.msrb.mxu1 %v647_v3  ;;  %279 = vmatpush.msrb.mxu2 %v647_v3 }
  0x39   :  { %307 = vmatpush.msrb.mxu3 %v647_v3  ;;  %224 = vmatpush.msrb.mxu0 %v649_v5 }
  0x3a   :  { %252 = vmatpush.msrb.mxu1 %v649_v5  ;;  %280 = vmatpush.msrb.mxu2 %v649_v5 }
  0x3b   :  { %308 = vmatpush.msrb.mxu3 %v649_v5  ;;  %225 = vmatpush.msrb.mxu0 %v654_v7 }
  0x3c   :  { %253 = vmatpush.msrb.mxu1 %v654_v7  ;;  %281 = vmatpush.msrb.mxu2 %v654_v7 }
  0x3d   :  { %309 = vmatpush.msrb.mxu3 %v654_v7  ;;  %226 = vmatpush.msrb.mxu0 %v659_v9 }
  0x3e   :  { %254 = vmatpush.msrb.mxu1 %v659_v9  ;;  %282 = vmatpush.msrb.mxu2 %v659_v9 }
  0x3f   :  { %310 = vmatpush.msrb.mxu3 %v659_v9  ;;  %227 = vmatpush.msrb.mxu0 %v664_v11 }
  0x40   :  { %255 = vmatpush.msrb.mxu1 %v664_v11  ;;  %283 = vmatpush.msrb.mxu2 %v664_v11 }
  0x41   :  { %311 = vmatpush.msrb.mxu3 %v664_v11  ;;  %228 = vmatpush.msrb.mxu0 %v669_v13 }
  0x42   :  { %256 = vmatpush.msrb.mxu1 %v669_v13  ;;  %284 = vmatpush.msrb.mxu2 %v669_v13 }
  0x43   :  { %312 = vmatpush.msrb.mxu3 %v669_v13  ;;  %229 = vmatpush.msrb.mxu0 %v674_v15 }
  0x44   :  { %257 = vmatpush.msrb.mxu1 %v674_v15  ;;  %285 = vmatpush.msrb.mxu2 %v674_v15 }
  0x45   :  { %313 = vmatpush.msrb.mxu3 %v674_v15  ;;  %230 = vmatpush.msrb.mxu0 %v679_v17 }
  0x46   :  { %258 = vmatpush.msrb.mxu1 %v679_v17  ;;  %286 = vmatpush.msrb.mxu2 %v679_v17 }
  0x47   :  { %314 = vmatpush.msrb.mxu3 %v679_v17  ;;  %231 = vmatpush.msrb.mxu0 %v684_v19 }
  0x48   :  { %259 = vmatpush.msrb.mxu1 %v684_v19  ;;  %287 = vmatpush.msrb.mxu2 %v684_v19 }
  0x49   :  { %315 = vmatpush.msrb.mxu3 %v684_v19  ;;  %232 = vmatpush.msrb.mxu0 %v689_v21 }
  0x4a   :  { %260 = vmatpush.msrb.mxu1 %v689_v21  ;;  %288 = vmatpush.msrb.mxu2 %v689_v21 }
  0x4b   :  { %316 = vmatpush.msrb.mxu3 %v689_v21  ;;  %233 = vmatpush.msrb.mxu0 %v694_v23 }
  0x4c   :  { %261 = vmatpush.msrb.mxu1 %v694_v23  ;;  %289 = vmatpush.msrb.mxu2 %v694_v23 }
  0x4d   :  { %317 = vmatpush.msrb.mxu3 %v694_v23  ;;  %234 = vmatpush.msrb.mxu0 %v699_v25 }
  0x4e   :  { %262 = vmatpush.msrb.mxu1 %v699_v25  ;;  %290 = vmatpush.msrb.mxu2 %v699_v25 }
  0x4f   :  { %318 = vmatpush.msrb.mxu3 %v699_v25  ;;  %235 = vmatpush.msrb.mxu0 %v704_v27 }
  0x50   :  { %263 = vmatpush.msrb.mxu1 %v704_v27  ;;  %291 = vmatpush.msrb.mxu2 %v704_v27 }
  0x51   :  { %319 = vmatpush.msrb.mxu3 %v704_v27  ;;  %236 = vmatpush.msrb.mxu0 %v709_v29 }
  0x52   :  { %264 = vmatpush.msrb.mxu1 %v709_v29  ;;  %292 = vmatpush.msrb.mxu2 %v709_v29 }
  0x53   :  { %320 = vmatpush.msrb.mxu3 %v709_v29  ;;  %237 = vmatpush.msrb.mxu0 %v714_v31 }
  0x54   :  { %265 = vmatpush.msrb.mxu1 %v714_v31  ;;  %293 = vmatpush.msrb.mxu2 %v714_v31 }
  0x55   :  { %321 = vmatpush.msrb.mxu3 %v714_v31  ;;  %334 = vmatpush.msra.mxu0 %v644_v2 }
  0x56   :  { %395 = vmatpush.msra.mxu1 %v390_v6 }
  0x57   :  { %335 = vmatpush.msra.mxu0 %v647_v3 }
  0x59   :  { %336 = vmatpush.msra.mxu0 %v649_v5 }
  0x5b   :  { %337 = vmatpush.msra.mxu0 %v654_v7  ;;  %v389_v7 = vld [vmem:[#allocation9 + $0x70] sm:$0xff] }
  0x5c   :  { %396 = vmatpush.msra.mxu1 %v389_v7 }
  0x5d   :  { %338 = vmatpush.msra.mxu0 %v659_v9  ;;  %v387_v9 = vld [vmem:[#allocation9 + $0x60] sm:$0xff] }
  0x5e   :  { %397 = vmatpush.msra.mxu1 %v388_v8 }
  0x5f   :  { %339 = vmatpush.msra.mxu0 %v664_v11  ;;  %v385_v11 = vld [vmem:[#allocation9 + $0x50] sm:$0xff] }
  0x60   :  { %398 = vmatpush.msra.mxu1 %v387_v9 }
  0x61   :  { %340 = vmatpush.msra.mxu0 %v669_v13  ;;  %v383_v13 = vld [vmem:[#allocation9 + $0x40] sm:$0xff] }
  0x62   :  { %399 = vmatpush.msra.mxu1 %v386_v10 }
  0x63   :  { %341 = vmatpush.msra.mxu0 %v674_v15 }
  0x64   :  { %400 = vmatpush.msra.mxu1 %v385_v11 }
  0x65   :  { %342 = vmatpush.msra.mxu0 %v679_v17 }
  0x66   :  { %401 = vmatpush.msra.mxu1 %v384_v12 }
  0x67   :  { %343 = vmatpush.msra.mxu0 %v684_v19 }
  0x68   :  { %402 = vmatpush.msra.mxu1 %v383_v13 }
  0x69   :  { %344 = vmatpush.msra.mxu0 %v689_v21  ;;  %v381_v21 = vld [vmem:[#allocation9 + $0x30] sm:$0xff] }
  0x6a   :  { %403 = vmatpush.msra.mxu1 %v382_v14 }
  0x6b   :  { %345 = vmatpush.msra.mxu0 %v694_v23  ;;  %v379_v23 = vld [vmem:[#allocation9 + $0x20] sm:$0xff] }
  0x6c   :  { %404 = vmatpush.msra.mxu1 %v381_v21 }
  0x6d   :  { %346 = vmatpush.msra.mxu0 %v699_v25  ;;  %v377_v25 = vld [vmem:[#allocation9 + $0x10] sm:$0xff] }
  0x6e   :  { %405 = vmatpush.msra.mxu1 %v380_v22 }
  0x6f   :  { %347 = vmatpush.msra.mxu0 %v704_v27  ;;  %v375_v27 = vld [vmem:[#allocation9] sm:$0xff] }
  0x70   :  { %406 = vmatpush.msra.mxu1 %v379_v23 }
  0x71   :  { %348 = vmatpush.msra.mxu0 %v709_v29 }
  0x72   :  { %407 = vmatpush.msra.mxu1 %v378_v24 }
  0x73   :  { %349 = vmatpush.msra.mxu0 %v714_v31 }
  0x74   :  { %408 = vmatpush.msra.mxu1 %v377_v25 }
  0x76   :  { %409 = vmatpush.msra.mxu1 %v376_v26 }
  0x78   :  { %410 = vmatpush.msra.mxu1 %v375_v27 }
  0xb0   :  { %v123_v35 = vpop.f32.mrf.mxu0 }
  0xb1   :  { %v161_v36 = vpop.f32.mrf.mxu1  ;;  %v807_v37 = vadd.f32 %v443_v34, %v123_v35 }
  0xb3   :  { %v164_v38 = vadd.f32 %v161_v36, %v807_v37 }
  0xb5   :  { %445 = vtanh.f32 %v164_v38 }
  0xbb   :  { %v446_v39 = vpop.eup %445 }
  0xbc   :  { %182 = vmatmul.f32.vlgmr.msra.gmra.mxu2 %v446_v39 }
 0x13f   :  { %v183_v40 = vpop.f32.mrf.mxu2 }
 0x140   :  { %v187_v41 = vrot.slane %v183_v40, 7 }
 0x142   :  { %v189_v42 = vadd.f32 %v187_v41, %v807_v37 }
 0x144   :  { %447 = vtanh.f32 %v189_v42 }
 0x14a   :  { %v448_v43 = vpop.eup %447 }
 0x14b   :  { %v192_v44 = vrot.slane %v448_v43, 1  ;;  %v360_v49 = vsel %vm359_vm0, %v446_v39, %v448_v43 }
 0x14d   :  { %210 = vmatmul.f32.vlgmr.msra.gmra.mxu3 %v192_v44 }
 0x1d0   :  { %v211_v45 = vpop.f32.mrf.mxu3 }
 0x1d1   :  { %v215_v46 = vrot.slane %v211_v45, 6 }
 0x1d3   :  { %v217_v47 = vadd.f32 %v215_v46, %v807_v37 }
 0x1d5   :  { %449 = vtanh.f32 %v217_v47 }
 0x1db   :  { %v450_v48 = vpop.eup %449 }
 0x1dc   :  { %v220_v50 = vrot.slane %v450_v48, 2  ;;  %v362_v51 = vsel %vm361_vm1, %v360_v49, %v450_v48 }
 0x1de   :  { %238 = vmatmul.f32.vlgmr.msrb.gmra.mxu0 %v220_v50 }
 0x25b   :  { %v239_v52 = vpop.f32.mrf.mxu0 }
 0x25c   :  { %v243_v53 = vrot.slane %v239_v52, 5 }
 0x25e   :  { %v245_v54 = vadd.f32 %v243_v53, %v807_v37 }
 0x260   :  { %451 = vtanh.f32 %v245_v54 }
 0x266   :  { %v452_v55 = vpop.eup %451 }
 0x267   :  { %v248_v56 = vrot.slane %v452_v55, 3  ;;  %v364_v57 = vsel %vm363_vm2, %v362_v51, %v452_v55 }
 0x269   :  { %266 = vmatmul.f32.vlgmr.msrb.gmra.mxu1 %v248_v56 }
 0x2e6   :  { %v267_v58 = vpop.f32.mrf.mxu1 }
 0x2e7   :  { %v271_v59 = vrot.slane %v267_v58, 4 }
 0x2e9   :  { %v273_v60 = vadd.f32 %v271_v59, %v807_v37 }
 0x2eb   :  { %453 = vtanh.f32 %v273_v60 }
 0x2f1   :  { %v454_v61 = vpop.eup %453 }
 0x2f2   :  { %v276_v62 = vrot.slane %v454_v61, 4  ;;  %v366_v63 = vsel %vm365_vm3, %v364_v57, %v454_v61 }
 0x2f4   :  { %294 = vmatmul.f32.vlgmr.msrb.gmra.mxu2 %v276_v62 }
 0x377   :  { %v295_v0 = vpop.f32.mrf.mxu2 }
 0x378   :  { %v299_v1 = vrot.slane %v295_v0, 3 }
 0x37a   :  { %v301_v2 = vadd.f32 %v299_v1, %v807_v37 }
 0x37c   :  { %455 = vtanh.f32 %v301_v2 }
 0x382   :  { %v456_v3 = vpop.eup %455 }
 0x383   :  { %v304_v4 = vrot.slane %v456_v3, 5  ;;  %v368_v5 = vsel %vm367_vm4, %v366_v63, %v456_v3 }
 0x385   :  { %322 = vmatmul.f32.vlgmr.msrb.gmra.mxu3 %v304_v4 }
 0x408   :  { %v323_v15 = vpop.f32.mrf.mxu3 }
 0x409   :  { %v327_v16 = vrot.slane %v323_v15, 2 }
 0x40b   :  { %v329_v17 = vadd.f32 %v327_v16, %v807_v37 }
 0x40d   :  { %457 = vtanh.f32 %v329_v17 }
 0x413   :  { %v458_v18 = vpop.eup %457 }
 0x414   :  { %v332_v19 = vrot.slane %v458_v18, 6  ;;  %v370_v20 = vsel %vm369_vm5, %v368_v5, %v458_v18 }
 0x416   :  { %350 = vmatmul.f32.vlgmr.msra.gmra.mxu0 %v332_v19 }
 0x493   :  { %v351_v28 = vpop.f32.mrf.mxu0 }
 0x494   :  { %v355_v29 = vrot.slane %v351_v28, 1 }
 0x496   :  { %v357_v30 = vadd.f32 %v355_v29, %v807_v37 }
 0x498   :  { %459 = vtanh.f32 %v357_v30 }
 0x49e   :  { %v460_v31 = vpop.eup %459 }
 0x49f   :  { %v372_v32 = vsel %vm371_vm6, %v370_v20, %v460_v31 }
 0x4a0   :  { %411 = vmatmul.f32.vlgmr.msra.gmra.mxu1 %v372_v32 }
 0x51d   :  { %v412_v34 = vpop.f32.mrf.mxu1 }
 0x51e   :  { %v413_v35 = vadd.f32 %v444_v33, %v412_v34 }
 0x520   :  { %415 = vst [vmem:[#allocation11] sm:$0xff] %v413_v35 }
 0x521   :  { %426 = dma.vmem_to_hbm [thread:$0]  %s422_s19, 128, %s424_s22, [#allocation5]  }
 0x522   :  { %587 = dma.done.wait [#allocation5], 128  }
 0x523   :  { %588 = vsyncadd [#allocation5], 4294967168 }
 0x524   :  { %431 = vsyncpa [#allocation4], 1 }
 0x525   :  { %432 = vsyncpa [#allocation7], 1 }
 0x526   :  { %433 = vsyncpa [#allocation10], 1 }
 0x527   :  { %434 = vsyncpa [#allocation5], 1 }

</bundles_post_ra>
